<compile_context>
chip_gen: v7x
topology: tpu7x:2x2x1
jax: 0.10.0
libtpu: 0.0.40
codegen_flags: <defaults>
</compile_context>

<pallas_src>
import jax
import jax.numpy as jnp
from jax.experimental import pallas as pl
from jax.experimental.pallas import tpu as pltpu


def _head_kernel(x_ref, w_ref, b_ref, out_ref):
    """softmax(cls @ W + b) for one batch tile. Dropout(0.5) is identity in eval."""
    x = x_ref[...]
    logits = jnp.dot(x.astype(w_ref.dtype), w_ref[...],
                     preferred_element_type=jnp.float32) + b_ref[...]
    # Max-stabilized softmax over the (lane-padded) class axis; padded classes carry
    # a -1e30 bias so exp() underflows to 0 and they take no probability mass.
    z = logits - jnp.max(logits, axis=-1, keepdims=True)
    e = jnp.exp(z)
    denom = jnp.sum(e, axis=-1, keepdims=True)
    out_ref[...] = (e * pl.reciprocal(denom, approx=True)).astype(out_ref.dtype)


def _num_tensorcores():
    """Best-effort TensorCore-per-chip count (v7x has 2; v5e/v6e have 1)."""
    try:
        kind = jax.devices()[0].device_kind.lower()
    except Exception:
        return 1
    return 2 if "v7" in kind else 1


def _pick_block_b(batch, fits, tc_count):
    """Largest sublane-friendly batch tile dividing `batch` that fits VMEM.

    On 2-TC chips, prefer a tile that leaves >=2 grid steps so the 'parallel'
    grid axis can be sharded across both TensorCores.
    """
    cands = [c for c in (4096, 2048, 1024, 512, 256, 128, 64, 32, 16, 8)
             if batch % c == 0 and fits(c)]
    if tc_count >= 2:
        small = [c for c in cands if c <= batch // 2]
        if small:
            return small[0]
        if batch % 2 == 0 and batch // 2 >= 1 and fits(batch // 2):
            return batch // 2
    if cands:
        return cands[0]
    return batch  # awkward/small batch: one full-extent tile


def transformer_forward(last_hidden_state, w, b, *,
                        matmul_dtype=jnp.bfloat16, fuse_cls=True):
    """last_hidden_state: (B, T, D) -- stands in for base_model(...).last_hidden_state
       (f32 or bf16; bf16 is the bandwidth-optimal path).
       w: (D, C) Linear weight stored transposed (y = x @ w + b); b: (C,) or (1, C)."""
    B, T, D = last_hidden_state.shape
    Dw, C = w.shape
    assert Dw == D

    # --- parameter prep (tiny, one matmul-free pass) -------------------------------
    # Lane-pad the class dim to a multiple of 128: zero-pad W, -1e30-pad the bias so
    # padded classes get ~0 probability; output is sliced back to C below.
    Cp = max(128, ((C + 127) // 128) * 128)
    w_p = jnp.zeros((D, Cp), matmul_dtype).at[:, :C].set(w.astype(matmul_dtype))
    b_p = jnp.full((1, Cp), -1e30, jnp.float32).at[:, :C].set(
        jnp.reshape(b, (1, C)).astype(jnp.float32))

    in_bytes = jnp.dtype(last_hidden_state.dtype).itemsize
    w_bytes = jnp.dtype(matmul_dtype).itemsize

    def fits(bb, budget=12 << 20):
        # double-buffered CLS tile + (conservatively double-buffered) W/bias + output
        need = (2 * bb * D * in_bytes
                + 2 * (D * Cp * w_bytes + Cp * 4)
                + 2 * bb * Cp * 4)
        return need <= budget

    bb = _pick_block_b(B, fits, _num_tensorcores())
    grid = (B // bb,)

    if fuse_cls:
        # CLS gather fused into the BlockSpec: squeezed T dim, element 0 (CLS token).
        # Per-row strided DMA of D-contiguous chunks; VMEM footprint independent of T.
        x_arg = last_hidden_state
        x_spec = pl.BlockSpec((bb, None, D), lambda i: (i, 0, 0))
    else:
        # Fallback: materialize the CLS rows with an XLA strided slice (extra B*D
        # HBM round trip), then tile the 2-D result.
        x_arg = last_hidden_state[:, 0, :]
        x_spec = pl.BlockSpec((bb, D), lambda i: (i, 0))

    grid_spec = pltpu.PrefetchScalarGridSpec(
        num_scalar_prefetch=0,
        grid=grid,
        in_specs=[
            x_spec,
            pl.BlockSpec((D, Cp), lambda i: (0, 0)),   # weight: VMEM-resident
            pl.BlockSpec((1, Cp), lambda i: (0, 0)),   # bias:   VMEM-resident
        ],
        out_specs=pl.BlockSpec((bb, Cp), lambda i: (i, 0)),
    )

    cost = pl.CostEstimate(
        flops=2 * B * D * Cp,
        transcendentals=B * Cp,
        bytes_accessed=B * D * in_bytes + D * Cp * w_bytes + Cp * 4 + B * Cp * 4,
    )

    out_padded = pl.pallas_call(
        _head_kernel,
        out_shape=jax.ShapeDtypeStruct((B, Cp), jnp.float32),
        grid_spec=grid_spec,
        compiler_params=pltpu.CompilerParams(
            dimension_semantics=("parallel",)),        # batch tiles -> megacore on v7x
        cost_estimate=cost,
    )(x_arg, w_p, b_p)

    return out_padded[:, :C]


def init_params(key, hidden_size, num_classes):
    """Deterministic init mirroring nn.Linear(hidden_size, num_classes)."""
    k_w, k_b = jax.random.split(key)
    bound = 1.0 / jnp.sqrt(float(hidden_size))
    w = jax.random.uniform(k_w, (hidden_size, num_classes), jnp.float32, -bound, bound)
    b = jax.random.uniform(k_b, (1, num_classes), jnp.float32, -bound, bound)
    return w, b


if __name__ == "__main__":
    B, T, D, C = 16, 8, 128, 4      # batch, seq_len, hidden_size, num_classes
    key = jax.random.PRNGKey(0)
    k_param, k_x = jax.random.split(key)

    w, b = init_params(k_param, hidden_size=D, num_classes=C)
    # stands in for base_model(**inputs).last_hidden_state (bf16 encoder output).
    last_hidden_state = jax.random.normal(k_x, (B, T, D), jnp.float32).astype(jnp.bfloat16)

    try:
        out = jax.block_until_ready(
            transformer_forward(last_hidden_state, w, b, fuse_cls=True))
    except Exception:
        # Insurance: if the squeezed-T BlockSpec is rejected on this backend,
        # fall back to slicing the CLS row in the wrapper (known-good path).
        out = jax.block_until_ready(
            transformer_forward(last_hidden_state, w, b, fuse_cls=False))

    # Pure-JAX reference: softmax(linear(dropout_eval(cls_feats))) in f32.
    cls_f32 = last_hidden_state[:, 0, :].astype(jnp.float32)
    ref = jax.nn.softmax(cls_f32 @ w + b, axis=-1)

    assert out.shape == (B, C)
    assert jnp.allclose(out, ref, atol=1e-2, rtol=1e-2)
    assert jnp.allclose(jnp.sum(out, axis=-1), 1.0, atol=1e-2)
    print("KERNEL_OK")
</pallas_src>

<mosaic_0001>
module attributes {stable_mosaic.version = 11 : i64} {
  func.func @_head_kernel(%arg0: i32, %arg1: memref<16x128xbf16, #tpu.memory_space<vmem>>, %arg2: memref<128x128xbf16, #tpu.memory_space<vmem>>, %arg3: memref<1x128xf32, #tpu.memory_space<vmem>>, %arg4: memref<16x128xf32, #tpu.memory_space<vmem>>) attributes {dimension_semantics = [#tpu.dimension_semantics<parallel>], iteration_bounds = array<i64: 1>, scalar_prefetch = 0 : i64, scratch_operands = 0 : i64, tpu.core_type = #tpu.core_type<tc>, window_params = [{transform_indices = @transform_0, window_bounds = array<i64: 16, 128>}, {pipeline_mode = #tpu.pipeline_mode<synchronous>, transform_indices = @transform_1, window_bounds = array<i64: 128, 128>}, {pipeline_mode = #tpu.pipeline_mode<synchronous>, transform_indices = @transform_2, window_bounds = array<i64: 1, 128>}, {transform_indices = @transform_3, window_bounds = array<i64: 16, 128>}]} {
    %c0 = arith.constant 0 : index
    %c0_0 = arith.constant 0 : index
    %0 = vector.load %arg1[%c0, %c0_0] : memref<16x128xbf16, #tpu.memory_space<vmem>>, vector<16x128xbf16>
    %c0_1 = arith.constant 0 : index
    %c0_2 = arith.constant 0 : index
    %1 = vector.load %arg2[%c0_1, %c0_2] : memref<128x128xbf16, #tpu.memory_space<vmem>>, vector<128x128xbf16>
    %cst = arith.constant dense<0.000000e+00> : vector<16x128xf32>
    %2 = tpu.matmul %0, %1, %cst {dimension_numbers = #tpu.dot_dimension_numbers<[1], [0], [0], [1], [0, 0, 1, 1], [], []>} : vector<16x128xbf16>, vector<128x128xbf16>, vector<16x128xf32> -> vector<16x128xf32>
    %c0_3 = arith.constant 0 : index
    %c0_4 = arith.constant 0 : index
    %3 = vector.load %arg3[%c0_3, %c0_4] : memref<1x128xf32, #tpu.memory_space<vmem>>, vector<1x128xf32>
    %4 = vector.broadcast %3 : vector<1x128xf32> to vector<16x128xf32>
    %5 = arith.addf %2, %4 : vector<16x128xf32>
    %cst_5 = arith.constant dense<0xFF800000> : vector<16xf32>
    %6 = vector.multi_reduction <maximumf>, %5, %cst_5 [1] : vector<16x128xf32> to vector<16xf32>
    %7 = vector.shape_cast %6 : vector<16xf32> to vector<16x1xf32>
    %8 = vector.broadcast %7 : vector<16x1xf32> to vector<16x128xf32>
    %9 = arith.subf %5, %8 : vector<16x128xf32>
    %10 = math.exp %9 : vector<16x128xf32>
    %cst_6 = arith.constant dense<0.000000e+00> : vector<16xf32>
    %11 = vector.multi_reduction <add>, %10, %cst_6 [1] : vector<16x128xf32> to vector<16xf32>
    %12 = vector.shape_cast %11 : vector<16xf32> to vector<16x1xf32>
    %13 = tpu.reciprocal %12 {approx = true} : vector<16x1xf32> -> vector<16x1xf32>
    %14 = vector.broadcast %13 : vector<16x1xf32> to vector<16x128xf32>
    %15 = arith.mulf %10, %14 : vector<16x128xf32>
    %c0_7 = arith.constant 0 : index
    %c0_8 = arith.constant 0 : index
    %16 = vector.load %arg4[%c0_7, %c0_8] : memref<16x128xf32, #tpu.memory_space<vmem>>, vector<16x128xf32>
    tpu.vector_store %arg4[%c0_7, %c0_8], %15 {strides = array<i32>} : memref<16x128xf32, #tpu.memory_space<vmem>>, vector<16x128xf32>,
    return
  }
  func.func @transform_0(%arg0: i32) -> (i32, i32) {
    %c0_i32 = arith.constant 0 : i32
    %c0_i32_0 = arith.constant 0 : i32
    return %arg0, %c0_i32 : i32, i32
  }
  func.func @transform_1(%arg0: i32) -> (i32, i32) {
    %c0_i32 = arith.constant 0 : i32
    %c0_i32_0 = arith.constant 0 : i32
    %c0_i32_1 = arith.constant 0 : i32
    return %c0_i32, %c0_i32_0 : i32, i32
  }
  func.func @transform_2(%arg0: i32) -> (i32, i32) {
    %c0_i32 = arith.constant 0 : i32
    %c0_i32_0 = arith.constant 0 : i32
    %c0_i32_1 = arith.constant 0 : i32
    return %c0_i32, %c0_i32_0 : i32, i32
  }
  func.func @transform_3(%arg0: i32) -> (i32, i32) {
    %c0_i32 = arith.constant 0 : i32
    %c0_i32_0 = arith.constant 0 : i32
    return %arg0, %c0_i32 : i32, i32
  }
}

</mosaic_0001>

<bundles_post_ra>
// kernel: tpu_custom_call.1
= control target key start
LH: loop header
LB: loop body
LE: loop exit
PB: predicated region body
PF: predicated region fallthrough
CT: control target
= control target key end

     0   :  { %8 = vsyncpa [#allocation3], 0  ;;  %s407_s0 = inlined_call_operand.hbm [shape: bf16[16,128], index: 0, kind: input, shape index: {}]   ;;  %s408_s1 = inlined_call_operand.hbm [shape: bf16[128,128], index: 1, kind: input, shape index: {}]   ;;  %s409_s2 = inlined_call_operand.vmem [shape: f32[1,128], index: 2, kind: input, shape index: {}]   ;;  %s410_s3 = inlined_call_operand.hbm [shape: f32[16,128], index: 3, kind: output, shape index: {}]  }
   0x1   :  { %9 = vsyncpa [#allocation6], 0 }
   0x2   :  { %10 = vsyncpa [#allocation4], 0  ;;  %s339_s12 = smov [#allocation2]   ;;  %s267_s16 = scalar_lea.hbm %s407_s0, 128 }
   0x3   :  { %s16_s13 = sshll.u32 %s339_s12, 4  ;;  %p268_p0 = scmp.ne.s32.totalorder %s407_s0, %s267_s16  ;;  %s17_s13 = int_to_ptr.vmem [resolvable:$true] %s16_s13 }
   0x4   :  { %p271_p1 = scmp.lt.u32.totalorder %s267_s16, %s407_s0 }
   0x6   :  { %p273_p2 = pnand %p271_p1, %p268_p0 }
   0x8   :  { %276 = shalt.err (!%p273_p2)
}
   0x9   :  { %s277_s21 = scalar_lea.vmem %s17_s13, 128  ;;  %p282_p4 = scmp.lt.s32.totalorder %s17_s13, %s17_s13 }
   0xa   :  { %p278_p3 = scmp.ne.s32.totalorder %s17_s13, %s277_s21  ;;  %p283_p5 = scmp.lt.s32.totalorder %s277_s21, %s277_s21 }
   0xc   :  { %p284_p6 = por %p283_p5, %p282_p4 }
   0xe   :  { %p285_p7 = pnand %p284_p6, %p278_p3 }
  0x10   :  { %288 = shalt.err (!%p285_p7)
}
  0x11   :  { %s340_s22 = smov 64   ;;  %s341_s23 = smov 4  }
  0x12   :  { %22 = dma.hbm_to_vmem [thread:$0]  %s407_s0, 128, %s17_s13, [#allocation3], %s340_s22, %s340_s22, %s341_s23  }
  0x13   :  { %s342_s26 = smov [#allocation5]   ;;  %s289_s30 = scalar_lea.hbm %s408_s1, 1024 }
  0x14   :  { %s28_s27 = sshll.u32 %s342_s26, 4  ;;  %p290_p8 = scmp.ne.s32.totalorder %s408_s1, %s289_s30  ;;  %s29_s27 = int_to_ptr.vmem [resolvable:$true] %s28_s27 }
  0x15   :  { %p293_p9 = scmp.lt.u32.totalorder %s289_s30, %s408_s1 }
  0x17   :  { %p295_p10 = pnand %p293_p9, %p290_p8 }
  0x19   :  { %298 = shalt.err (!%p295_p10)
}
  0x1a   :  { %s299_s8 = scalar_lea.vmem %s29_s27, 1024  ;;  %p304_p12 = scmp.lt.s32.totalorder %s29_s27, %s29_s27 }
  0x1b   :  { %p300_p11 = scmp.ne.s32.totalorder %s29_s27, %s299_s8  ;;  %p305_p13 = scmp.lt.s32.totalorder %s299_s8, %s299_s8 }
  0x1d   :  { %p306_p0 = por %p305_p13, %p304_p12 }
  0x1f   :  { %p307_p1 = pnand %p306_p0, %p300_p11 }
  0x21   :  { %310 = shalt.err (!%p307_p1)
}
  0x22   :  { %34 = dma.hbm_to_vmem [thread:$0]  %s408_s1, 1024, %s29_s27, [#allocation6], %s340_s22, %s340_s22, %s341_s23  }
  0x23   :  { %333 = dma.done.wait [#allocation3], 128  }
  0x24   :  { %334 = vsyncadd [#allocation3], 4294967168 }
  0x25   :  { %335 = dma.done.wait [#allocation6], 1024  }
  0x26   :  { %336 = vsyncadd [#allocation6], 4294966272  ;;  %v343_v0 = vmov 0.0   ;;  %vm344_vm0 = vmmov 0   ;;  %v250_v1 = vld [vmem:[#allocation5] sm:$0xff]   ;;  %v251_v2 = vld [vmem:[#allocation5 + $0x8] sm:$0xff]  }
  0x27   :  { %221 = vmatprep.subr.bf16.mxu0 %v343_v0  ;;  %237 = vmatprep.mubr.msk.bf16.mxu0 %vm344_vm0, %v343_v0  ;;  %v252_v3 = vld [vmem:[#allocation5 + $0x10] sm:$0xff]   ;;  %v253_v4 = vld [vmem:[#allocation5 + $0x18] sm:$0xff]   ;;  %v254_v5 = vld [vmem:[#allocation5 + $0x20] sm:$0xff]  }
  0x28   :  { %222 = vmatpush3.bf16.msra.mxu0 %v250_v1  ;;  %v255_v6 = vld [vmem:[#allocation5 + $0x28] sm:$0xff]   ;;  %v256_v7 = vld [vmem:[#allocation5 + $0x30] sm:$0xff]   ;;  %v257_v8 = vld [vmem:[#allocation5 + $0x38] sm:$0xff]  }
  0x29   :  { %223 = vmatprep.subr.bf16.mxu0 %v343_v0  ;;  %v258_v9 = vld [vmem:[#allocation2] sm:$0xff]  }
  0x2a   :  { %v202_v10 = vld [vmem:[%s409_s2] ss:$0 sm:$0xff]  ;;  %s345_s2 = smov [#allocation7]  }
  0x2b   :  { %s189_s11 = sshll.u32 %s345_s2, 4  ;;  %s190_s11 = int_to_ptr.vmem [resolvable:$true] %s189_s11 }
  0x2c   :  { %224 = vmatpush3.bf16.msra.mxu0 %v251_v2  ;;  %s311_s12 = scalar_lea.vmem %s190_s11, 256  ;;  %p316_p3 = scmp.lt.s32.totalorder %s190_s11, %s190_s11 }
  0x2d   :  { %225 = vmatprep.subr.bf16.mxu0 %v343_v0  ;;  %p312_p2 = scmp.ne.s32.totalorder %s190_s11, %s311_s12  ;;  %p317_p4 = scmp.lt.s32.totalorder %s311_s12, %s311_s12 }
  0x2f   :  { %p318_p5 = por %p317_p4, %p316_p3 }
  0x30   :  { %226 = vmatpush3.bf16.msra.mxu0 %v252_v3 }
  0x31   :  { %227 = vmatprep.subr.bf16.mxu0 %v343_v0  ;;  %p319_p6 = pnand %p318_p5, %p312_p2 }
  0x34   :  { %228 = vmatpush3.bf16.msra.mxu0 %v253_v4 }
  0x35   :  { %229 = vmatprep.subr.bf16.mxu0 %v343_v0 }
  0x38   :  { %230 = vmatpush3.bf16.msra.mxu0 %v254_v5 }
  0x39   :  { %231 = vmatprep.subr.bf16.mxu0 %v343_v0 }
  0x3c   :  { %232 = vmatpush3.bf16.msra.mxu0 %v255_v6 }
  0x3d   :  { %233 = vmatprep.subr.bf16.mxu0 %v343_v0 }
  0x40   :  { %234 = vmatpush3.bf16.msra.mxu0 %v256_v7 }
  0x41   :  { %235 = vmatprep.subr.bf16.mxu0 %v343_v0 }
  0x44   :  { %236 = vmatpush3.bf16.msra.mxu0 %v257_v8 }
  0x47   :  { %238 = vmatmul.mubr.bf16.vlgmr.msra.gmra.mrb[0].mxu0 %v258_v9 }
 0x11a   :  { %v157_v11 = vpop.f32.mrb[0].mxu0 }
 0x11b   :  { %v158_v12 = vadd.f32 %v202_v10, %v157_v11  ;;  %v239_v13 = vpop.f32.mrb[1].mxu0 }
 0x11c   :  { %v160_v14 = vpop.f32.mrb[2].mxu0 }
 0x11d   :  { %164 = vmax.xlane.f32.xlu0 %v158_v12  ;;  %v240_v15 = vpop.f32.mrb[3].mxu0  ;;  %v161_v16 = vadd.f32 %v202_v10, %v160_v14 }
 0x121   :  { %166 = vmax.xlane.f32.xlu0 %v161_v16 }
 0x1aa   :  { %v165_v17 = vpop.xlane.xlu0 %164 }
 0x1ab   :  { %v168_v18 = vsub.f32 %v158_v12, %v165_v17 }
 0x1ad   :  { %v170_v19 = vmul.f32 1.442695, %v168_v18 }
 0x1ae   :  { %v167_v20 = vpop.xlane.xlu0 %166 }
 0x1af   :  { %259 = vpow2.f32 %v170_v19  ;;  %v169_v21 = vsub.f32 %v161_v16, %v167_v20 }
 0x1b1   :  { %v172_v22 = vmul.f32 1.442695, %v169_v21 }
 0x1b3   :  { %261 = vpow2.f32 %v172_v22 }
 0x1b9   :  { %v260_v23 = vpop.eup %259 }
 0x1ba   :  { %174 = vadd.xlane.f32.xlu1 %v260_v23 }
 0x1bd   :  { %v262_v24 = vpop.eup %261 }
 0x1be   :  { %176 = vadd.xlane.f32.xlu1 %v262_v24 }
 0x247   :  { %v175_v25 = vpop.xlane.xlu1 %174 }
 0x248   :  { %263 = vrcp.f32 %v175_v25 }
 0x24b   :  { %v177_v26 = vpop.xlane.xlu1 %176 }
 0x24c   :  { %265 = vrcp.f32 %v177_v26 }
 0x252   :  { %v264_v27 = vpop.eup %263 }
 0x253   :  { %v180_v28 = vmul.f32 %v264_v27, %v260_v23 }
 0x255   :  { %182 = vst [vmem:[#allocation7] sm:$0xff] %v180_v28 }
 0x256   :  { %v266_v29 = vpop.eup %265 }
 0x257   :  { %v181_v30 = vmul.f32 %v266_v29, %v262_v24 }
 0x259   :  { %183 = vst [vmem:[#allocation7 + $0x8] sm:$0xff] %v181_v30 }
 0x25a   :  { %322 = shalt.err (!%p319_p6)
}
 0x25b   :  { %s323_s15 = scalar_lea.hbm %s410_s3, 256 }
 0x25c   :  { %p324_p7 = scmp.ne.s32.totalorder %s410_s3, %s323_s15  ;;  %p327_p8 = scmp.lt.u32.totalorder %s323_s15, %s410_s3 }
 0x25e   :  { %p329_p9 = pnand %p327_p8, %p324_p7 }
 0x260   :  { %332 = shalt.err (!%p329_p9)
}
 0x261   :  { %s346_s20 = smov 128   ;;  %s347_s21 = smov 8  }
 0x262   :  { %195 = dma.vmem_to_hbm [thread:$0]  %s190_s11, 256, %s410_s3, [#allocation4], %s346_s20, %s346_s20, %s347_s21  }
 0x263   :  { %337 = dma.done.wait [#allocation4], 256  }
 0x264   :  { %338 = vsyncadd [#allocation4], 4294967040 }
 0x265   :  { %199 = vsyncpa [#allocation3], 1 }
 0x266   :  { %200 = vsyncpa [#allocation6], 1 }
 0x267   :  { %201 = vsyncpa [#allocation4], 1 }

</bundles_post_ra>
